<compile_context>
chip_gen: v6e
topology: v6e:2x2x1
jax: 0.10.0
libtpu: 0.0.40
codegen_flags: <defaults>
</compile_context>

<pallas_src>
import jax
import jax.numpy as jnp
from jax.experimental import pallas as pl
from jax.experimental.pallas import tpu as pltpu


def _apply_activation(x, name):
    if name is None:
        return x
    if name == "relu":
        return jnp.maximum(x, 0.0)
    if name == "tanh":
        return jnp.tanh(x)
    raise ValueError(f"unsupported activation: {name}")


def _make_hexnet_kernel(num_hidden, activations):
    """Kernel ref order:
       x_ref,
       w_0, b_0, ..., w_{L-1}, b_{L-1},   # hidden Linear layers, (in, out) / (1, out)
       w_p, b_p,                          # policy head Linear
       w_v, b_v,                          # value head Linear
       policy_ref, value_ref              # outputs: (tb, action_dim), (tb, 1)
    """
    def kernel(*refs):
        x_ref = refs[0]
        hidden_refs = refs[1:1 + 2 * num_hidden]
        wp_ref, bp_ref, wv_ref, bv_ref = refs[1 + 2 * num_hidden: 5 + 2 * num_hidden]
        policy_ref, value_ref = refs[5 + 2 * num_hidden:]

        h = x_ref[...].astype(jnp.float32)

        # Hidden MLP stack (fused; activations never leave VMEM).
        for i in range(num_hidden):
            w_ref = hidden_refs[2 * i]
            b_ref = hidden_refs[2 * i + 1]
            h = jnp.dot(h, w_ref[...], preferred_element_type=jnp.float32) + b_ref[...]
            h = _apply_activation(h, activations[i])

        # Policy head: Linear + numerically-stable Softmax along the action dim.
        logits = jnp.dot(h, wp_ref[...], preferred_element_type=jnp.float32) + bp_ref[...]
        m = jnp.max(logits, axis=-1, keepdims=True)
        e = jnp.exp(logits - m)
        denom = jnp.sum(e, axis=-1, keepdims=True)
        policy_ref[...] = e / denom

        # Value head: Linear + Sigmoid.
        v = jnp.dot(h, wv_ref[...], preferred_element_type=jnp.float32) + bv_ref[...]
        value_ref[...] = 1.0 / (1.0 + jnp.exp(-v))

    return kernel


def simple_hexnet_forward(state, hidden_weights, hidden_biases, activations,
                          policy_w, policy_b, value_w, value_b, batch_tile=8):
    """Pallas implementation of SimpleHexNet.forward.

    Weights are given in PyTorch nn.Linear layout: (out_features, in_features);
    biases as (out_features,). Returns (action_probs, value) just like the module.
    """
    B, state_dim = state.shape
    num_hidden = len(hidden_weights)
    action_dim = policy_w.shape[0]

    # Glue (layout only, in plain JAX): transpose to (in, out) so out-features sit on
    # the lane dimension; biases become (1, out) row vectors for broadcast.
    ws = [jnp.asarray(w, jnp.float32).T for w in hidden_weights]
    bs = [jnp.asarray(b, jnp.float32).reshape(1, -1) for b in hidden_biases]
    wp = jnp.asarray(policy_w, jnp.float32).T
    bp = jnp.asarray(policy_b, jnp.float32).reshape(1, -1)
    wv = jnp.asarray(value_w, jnp.float32).T
    bv = jnp.asarray(value_b, jnp.float32).reshape(1, -1)
    x = jnp.asarray(state, jnp.float32)

    tb = min(batch_tile, B)
    assert B % tb == 0, "batch must be divisible by the batch tile"
    grid = (B // tb,)

    def full_spec(shape):
        # Whole-array (VMEM-resident) parameter block, identical for every batch tile.
        return pl.BlockSpec(shape, lambda i, _s=shape: tuple(0 for _ in _s))

    in_specs = [pl.BlockSpec((tb, state_dim), lambda i: (i, 0))]
    operands = [x]
    for w, b in zip(ws, bs):
        in_specs += [full_spec(w.shape), full_spec(b.shape)]
        operands += [w, b]
    in_specs += [full_spec(wp.shape), full_spec(bp.shape),
                 full_spec(wv.shape), full_spec(bv.shape)]
    operands += [wp, bp, wv, bv]

    out_shape = (jax.ShapeDtypeStruct((B, action_dim), jnp.float32),
                 jax.ShapeDtypeStruct((B, 1), jnp.float32))
    out_specs = (pl.BlockSpec((tb, action_dim), lambda i: (i, 0)),
                 pl.BlockSpec((tb, 1), lambda i: (i, 0)))

    kernel = _make_hexnet_kernel(num_hidden, list(activations))

    policy, value = pl.pallas_call(
        kernel,
        out_shape=out_shape,
        grid=grid,
        in_specs=in_specs,
        out_specs=out_specs,
        compiler_params=pltpu.CompilerParams(
            dimension_semantics=("parallel",)),   # batch tiles -> both TCs on v7x
    )(*operands)
    return policy, value


def _reference(state, hidden_weights, hidden_biases, activations,
               policy_w, policy_b, value_w, value_b):
    """Pure-JAX reference mirroring SimpleHexNet.forward (for correctness check)."""
    h = jnp.asarray(state, jnp.float32)
    for w, b, act in zip(hidden_weights, hidden_biases, activations):
        h = h @ jnp.asarray(w, jnp.float32).T + jnp.asarray(b, jnp.float32)
        if act == "relu":
            h = jnp.maximum(h, 0.0)
        elif act == "tanh":
            h = jnp.tanh(h)
    logits = h @ jnp.asarray(policy_w, jnp.float32).T + jnp.asarray(policy_b, jnp.float32)
    action = jax.nn.softmax(logits, axis=1)
    v = h @ jnp.asarray(value_w, jnp.float32).T + jnp.asarray(value_b, jnp.float32)
    value = jax.nn.sigmoid(v)
    return action, value


if __name__ == "__main__":
    key = jax.random.PRNGKey(0)

    # Small shapes consistent with the module: flattened 4x4 hex board.
    B = 16
    state_dim = 16
    hidden_layers = [32, 32]
    activations = ["relu", "relu"]   # corresponds to activation_functions=[nn.ReLU, nn.ReLU]
    action_dim = 16

    keys = iter(jax.random.split(key, 2 * len(hidden_layers) + 6))
    x = jax.random.normal(next(keys), (B, state_dim), dtype=jnp.float32)

    hidden_ws, hidden_bs = [], []
    in_dim = state_dim
    for hdim in hidden_layers:
        hidden_ws.append(0.2 * jax.random.normal(next(keys), (hdim, in_dim), dtype=jnp.float32))
        hidden_bs.append(0.1 * jax.random.normal(next(keys), (hdim,), dtype=jnp.float32))
        in_dim = hdim
    policy_w = 0.2 * jax.random.normal(next(keys), (action_dim, in_dim), dtype=jnp.float32)
    policy_b = 0.1 * jax.random.normal(next(keys), (action_dim,), dtype=jnp.float32)
    value_w = 0.2 * jax.random.normal(next(keys), (1, in_dim), dtype=jnp.float32)
    value_b = 0.1 * jax.random.normal(next(keys), (1,), dtype=jnp.float32)

    policy, value = simple_hexnet_forward(x, hidden_ws, hidden_bs, activations,
                                          policy_w, policy_b, value_w, value_b)
    policy, value = jax.block_until_ready((policy, value))

    ref_p, ref_v = _reference(x, hidden_ws, hidden_bs, activations,
                              policy_w, policy_b, value_w, value_b)

    assert policy.shape == (B, action_dim)
    assert value.shape == (B, 1)
    assert jnp.allclose(jnp.sum(policy, axis=1), 1.0, atol=1e-4), "softmax rows must sum to 1"
    assert jnp.allclose(policy, ref_p, atol=1e-4, rtol=1e-4), \
        f"policy max abs err {jnp.max(jnp.abs(policy - ref_p))}"
    assert jnp.allclose(value, ref_v, atol=1e-4, rtol=1e-4), \
        f"value max abs err {jnp.max(jnp.abs(value - ref_v))}"

    print("KERNEL_OK")
</pallas_src>

<mosaic_0001>
module attributes {stable_mosaic.version = 11 : i64} {
  func.func @kernel(%arg0: i32, %arg1: memref<8x16xf32, #tpu.memory_space<vmem>>, %arg2: memref<16x32xf32, #tpu.memory_space<vmem>>, %arg3: memref<1x32xf32, #tpu.memory_space<vmem>>, %arg4: memref<32x32xf32, #tpu.memory_space<vmem>>, %arg5: memref<1x32xf32, #tpu.memory_space<vmem>>, %arg6: memref<32x16xf32, #tpu.memory_space<vmem>>, %arg7: memref<1x16xf32, #tpu.memory_space<vmem>>, %arg8: memref<32x1xf32, #tpu.memory_space<vmem>>, %arg9: memref<1x1xf32, #tpu.memory_space<vmem>>, %arg10: memref<8x16xf32, #tpu.memory_space<vmem>>, %arg11: memref<8x1xf32, #tpu.memory_space<vmem>>) attributes {dimension_semantics = [#tpu.dimension_semantics<parallel>], iteration_bounds = array<i64: 2>, scalar_prefetch = 0 : i64, scratch_operands = 0 : i64, tpu.core_type = #tpu.core_type<tc>, window_params = [{transform_indices = @transform_0, window_bounds = array<i64: 8, 16>}, {pipeline_mode = #tpu.pipeline_mode<synchronous>, transform_indices = @transform_1, window_bounds = array<i64: 16, 32>}, {pipeline_mode = #tpu.pipeline_mode<synchronous>, transform_indices = @transform_2, window_bounds = array<i64: 1, 32>}, {pipeline_mode = #tpu.pipeline_mode<synchronous>, transform_indices = @transform_3, window_bounds = array<i64: 32, 32>}, {pipeline_mode = #tpu.pipeline_mode<synchronous>, transform_indices = @transform_4, window_bounds = array<i64: 1, 32>}, {pipeline_mode = #tpu.pipeline_mode<synchronous>, transform_indices = @transform_5, window_bounds = array<i64: 32, 16>}, {pipeline_mode = #tpu.pipeline_mode<synchronous>, transform_indices = @transform_6, window_bounds = array<i64: 1, 16>}, {pipeline_mode = #tpu.pipeline_mode<synchronous>, transform_indices = @transform_7, window_bounds = array<i64: 32, 1>}, {pipeline_mode = #tpu.pipeline_mode<synchronous>, transform_indices = @transform_8, window_bounds = array<i64: 1, 1>}, {transform_indices = @transform_9, window_bounds = array<i64: 8, 16>}, {transform_indices = @transform_10, window_bounds = array<i64: 8, 1>}]} {
    %c0 = arith.constant 0 : index
    %c0_0 = arith.constant 0 : index
    %0 = vector.load %arg1[%c0, %c0_0] : memref<8x16xf32, #tpu.memory_space<vmem>>, vector<8x16xf32>
    %c0_1 = arith.constant 0 : index
    %c0_2 = arith.constant 0 : index
    %1 = vector.load %arg2[%c0_1, %c0_2] : memref<16x32xf32, #tpu.memory_space<vmem>>, vector<16x32xf32>
    %cst = arith.constant dense<0.000000e+00> : vector<8x32xf32>
    %2 = tpu.matmul %0, %1, %cst {dimension_numbers = #tpu.dot_dimension_numbers<[1], [0], [0], [1], [0, 0, 1, 1], [], []>} : vector<8x16xf32>, vector<16x32xf32>, vector<8x32xf32> -> vector<8x32xf32>
    %c0_3 = arith.constant 0 : index
    %c0_4 = arith.constant 0 : index
    %3 = vector.load %arg3[%c0_3, %c0_4] : memref<1x32xf32, #tpu.memory_space<vmem>>, vector<1x32xf32>
    %4 = vector.broadcast %3 : vector<1x32xf32> to vector<8x32xf32>
    %5 = arith.addf %2, %4 : vector<8x32xf32>
    %cst_5 = arith.constant 0.000000e+00 : f32
    %6 = vector.broadcast %cst_5 : f32 to vector<8x32xf32>
    %7 = arith.maximumf %5, %6 : vector<8x32xf32>
    %c0_6 = arith.constant 0 : index
    %c0_7 = arith.constant 0 : index
    %8 = vector.load %arg4[%c0_6, %c0_7] : memref<32x32xf32, #tpu.memory_space<vmem>>, vector<32x32xf32>
    %cst_8 = arith.constant dense<0.000000e+00> : vector<8x32xf32>
    %9 = tpu.matmul %7, %8, %cst_8 {dimension_numbers = #tpu.dot_dimension_numbers<[1], [0], [0], [1], [0, 0, 1, 1], [], []>} : vector<8x32xf32>, vector<32x32xf32>, vector<8x32xf32> -> vector<8x32xf32>
    %c0_9 = arith.constant 0 : index
    %c0_10 = arith.constant 0 : index
    %10 = vector.load %arg5[%c0_9, %c0_10] : memref<1x32xf32, #tpu.memory_space<vmem>>, vector<1x32xf32>
    %11 = vector.broadcast %10 : vector<1x32xf32> to vector<8x32xf32>
    %12 = arith.addf %9, %11 : vector<8x32xf32>
    %cst_11 = arith.constant 0.000000e+00 : f32
    %13 = vector.broadcast %cst_11 : f32 to vector<8x32xf32>
    %14 = arith.maximumf %12, %13 : vector<8x32xf32>
    %c0_12 = arith.constant 0 : index
    %c0_13 = arith.constant 0 : index
    %15 = vector.load %arg6[%c0_12, %c0_13] : memref<32x16xf32, #tpu.memory_space<vmem>>, vector<32x16xf32>
    %cst_14 = arith.constant dense<0.000000e+00> : vector<8x16xf32>
    %16 = tpu.matmul %14, %15, %cst_14 {dimension_numbers = #tpu.dot_dimension_numbers<[1], [0], [0], [1], [0, 0, 1, 1], [], []>} : vector<8x32xf32>, vector<32x16xf32>, vector<8x16xf32> -> vector<8x16xf32>
    %c0_15 = arith.constant 0 : index
    %c0_16 = arith.constant 0 : index
    %17 = vector.load %arg7[%c0_15, %c0_16] : memref<1x16xf32, #tpu.memory_space<vmem>>, vector<1x16xf32>
    %18 = vector.broadcast %17 : vector<1x16xf32> to vector<8x16xf32>
    %19 = arith.addf %16, %18 : vector<8x16xf32>
    %cst_17 = arith.constant dense<0xFF800000> : vector<8xf32>
    %20 = vector.multi_reduction <maximumf>, %19, %cst_17 [1] : vector<8x16xf32> to vector<8xf32>
    %21 = vector.shape_cast %20 : vector<8xf32> to vector<8x1xf32>
    %22 = vector.broadcast %21 : vector<8x1xf32> to vector<8x16xf32>
    %23 = arith.subf %19, %22 : vector<8x16xf32>
    %24 = math.exp %23 : vector<8x16xf32>
    %cst_18 = arith.constant dense<0.000000e+00> : vector<8xf32>
    %25 = vector.multi_reduction <add>, %24, %cst_18 [1] : vector<8x16xf32> to vector<8xf32>
    %26 = vector.shape_cast %25 : vector<8xf32> to vector<8x1xf32>
    %27 = vector.broadcast %26 : vector<8x1xf32> to vector<8x16xf32>
    %28 = arith.divf %24, %27 : vector<8x16xf32>
    %c0_19 = arith.constant 0 : index
    %c0_20 = arith.constant 0 : index
    %29 = vector.load %arg10[%c0_19, %c0_20] : memref<8x16xf32, #tpu.memory_space<vmem>>, vector<8x16xf32>
    tpu.vector_store %arg10[%c0_19, %c0_20], %28 {strides = array<i32>} : memref<8x16xf32, #tpu.memory_space<vmem>>, vector<8x16xf32>,
    %c0_21 = arith.constant 0 : index
    %c0_22 = arith.constant 0 : index
    %30 = vector.load %arg8[%c0_21, %c0_22] : memref<32x1xf32, #tpu.memory_space<vmem>>, vector<32x1xf32>
    %cst_23 = arith.constant dense<0.000000e+00> : vector<8x1xf32>
    %31 = tpu.matmul %14, %30, %cst_23 {dimension_numbers = #tpu.dot_dimension_numbers<[1], [0], [0], [1], [0, 0, 1, 1], [], []>} : vector<8x32xf32>, vector<32x1xf32>, vector<8x1xf32> -> vector<8x1xf32>
    %c0_24 = arith.constant 0 : index
    %c0_25 = arith.constant 0 : index
    %32 = vector.load %arg9[%c0_24, %c0_25] : memref<1x1xf32, #tpu.memory_space<vmem>>, vector<1x1xf32>
    %33 = vector.broadcast %32 : vector<1x1xf32> to vector<8x1xf32>
    %34 = arith.addf %31, %33 : vector<8x1xf32>
    %cst_26 = arith.constant 0.000000e+00 : f32
    %35 = vector.broadcast %cst_26 : f32 to vector<8x1xf32>
    %36 = arith.subf %35, %34 : vector<8x1xf32>
    %37 = math.exp %36 : vector<8x1xf32>
    %cst_27 = arith.constant 1.000000e+00 : f32
    %38 = vector.broadcast %cst_27 : f32 to vector<8x1xf32>
    %39 = arith.addf %38, %37 : vector<8x1xf32>
    %cst_28 = arith.constant 1.000000e+00 : f32
    %40 = vector.broadcast %cst_28 : f32 to vector<8x1xf32>
    %41 = arith.divf %40, %39 : vector<8x1xf32>
    %c0_29 = arith.constant 0 : index
    %c0_30 = arith.constant 0 : index
    %42 = vector.load %arg11[%c0_29, %c0_30] : memref<8x1xf32, #tpu.memory_space<vmem>>, vector<8x1xf32>
    tpu.vector_store %arg11[%c0_29, %c0_30], %41 {strides = array<i32>} : memref<8x1xf32, #tpu.memory_space<vmem>>, vector<8x1xf32>,
    return
  }
  func.func @transform_0(%arg0: i32) -> (i32, i32) {
    %c0_i32 = arith.constant 0 : i32
    %c0_i32_0 = arith.constant 0 : i32
    return %arg0, %c0_i32 : i32, i32
  }
  func.func @transform_1(%arg0: i32) -> (i32, i32) {
    %c0_i32 = arith.constant 0 : i32
    %c0_i32_0 = arith.constant 0 : i32
    %c0_i32_1 = arith.constant 0 : i32
    return %c0_i32, %c0_i32_0 : i32, i32
  }
  func.func @transform_2(%arg0: i32) -> (i32, i32) {
    %c0_i32 = arith.constant 0 : i32
    %c0_i32_0 = arith.constant 0 : i32
    %c0_i32_1 = arith.constant 0 : i32
    return %c0_i32, %c0_i32_0 : i32, i32
  }
  func.func @transform_3(%arg0: i32) -> (i32, i32) {
    %c0_i32 = arith.constant 0 : i32
    %c0_i32_0 = arith.constant 0 : i32
    %c0_i32_1 = arith.constant 0 : i32
    return %c0_i32, %c0_i32_0 : i32, i32
  }
  func.func @transform_4(%arg0: i32) -> (i32, i32) {
    %c0_i32 = arith.constant 0 : i32
    %c0_i32_0 = arith.constant 0 : i32
    %c0_i32_1 = arith.constant 0 : i32
    return %c0_i32, %c0_i32_0 : i32, i32
  }
  func.func @transform_5(%arg0: i32) -> (i32, i32) {
    %c0_i32 = arith.constant 0 : i32
    %c0_i32_0 = arith.constant 0 : i32
    %c0_i32_1 = arith.constant 0 : i32
    return %c0_i32, %c0_i32_0 : i32, i32
  }
  func.func @transform_6(%arg0: i32) -> (i32, i32) {
    %c0_i32 = arith.constant 0 : i32
    %c0_i32_0 = arith.constant 0 : i32
    %c0_i32_1 = arith.constant 0 : i32
    return %c0_i32, %c0_i32_0 : i32, i32
  }
  func.func @transform_7(%arg0: i32) -> (i32, i32) {
    %c0_i32 = arith.constant 0 : i32
    %c0_i32_0 = arith.constant 0 : i32
    %c0_i32_1 = arith.constant 0 : i32
    return %c0_i32, %c0_i32_0 : i32, i32
  }
  func.func @transform_8(%arg0: i32) -> (i32, i32) {
    %c0_i32 = arith.constant 0 : i32
    %c0_i32_0 = arith.constant 0 : i32
    %c0_i32_1 = arith.constant 0 : i32
    return %c0_i32, %c0_i32_0 : i32, i32
  }
  func.func @transform_9(%arg0: i32) -> (i32, i32) {
    %c0_i32 = arith.constant 0 : i32
    %c0_i32_0 = arith.constant 0 : i32
    return %arg0, %c0_i32 : i32, i32
  }
  func.func @transform_10(%arg0: i32) -> (i32, i32) {
    %c0_i32 = arith.constant 0 : i32
    %c0_i32_0 = arith.constant 0 : i32
    return %arg0, %c0_i32 : i32, i32
  }
}

</mosaic_0001>

<bundles_post_ra>
// kernel: tpu_custom_call.1
= control target key start
LH: loop header
LB: loop body
LE: loop exit
PB: predicated region body
PF: predicated region fallthrough
CT: control target
= control target key end

     0   :  { %s1236_s0 = inlined_call_operand.vmem [shape: f32[16,16], index: 0, kind: input, shape index: {}]   ;;  %s1237_s1 = inlined_call_operand.vmem [shape: f32[16,32], index: 1, kind: input, shape index: {}]   ;;  %s1238_s2 = inlined_call_operand.vmem [shape: f32[1,32], index: 2, kind: input, shape index: {}]   ;;  %s1239_s3 = inlined_call_operand.vmem [shape: f32[32,32], index: 3, kind: input, shape index: {}]   ;;  %s1240_s4 = inlined_call_operand.vmem [shape: f32[1,32], index: 4, kind: input, shape index: {}]   ;;  %s1241_s5 = inlined_call_operand.vmem [shape: f32[32,16], index: 5, kind: input, shape index: {}]   ;;  %s1242_s6 = inlined_call_operand.vmem [shape: f32[1,16], index: 6, kind: input, shape index: {}]   ;;  %s1243_s7 = inlined_call_operand.vmem [shape: f32[32,1], index: 7, kind: input, shape index: {}]   ;;  %s1244_s8 = inlined_call_operand.<no memory space> [shape: f32[1,1], index: 8, kind: input, shape index: {}]   ;;  %s1245_s9 = inlined_call_operand.hbm [shape: f32[16,16], index: 9, kind: output, shape index: {0}]   ;;  %s1246_s10 = inlined_call_operand.vmem [shape: f32[16,1], index: 10, kind: output, shape index: {1}]  }
   0x1   :  { %v16_v0 = vstv %s1244_s8 }
   0x2   :  { %17 = vst [vmem:[#allocation2] sm:$0x1] %v16_v0 }
   0x3   :  { %18 = vsyncpa [#allocation4], 0 }
   0x4   :  { %20 = vsyncpa [#allocation4 + $0x1], 0  ;;  %s1077_s15 = smov 0   ;;  %s1079_s16 = smov 0  }
   0x5   :  { %s1081_s17 = smov 0   ;;  %s1083_s18 = smov 0  }
   0x6 LB: > { %s1098_s8 = sadd.s32 4294967295, %s1014_s18   ;;  %s828_s19 = sadd.s32 4294967294, %s1014_s18   ;;  %s1014_s18 = sphi %s1083_s18, %s1252_s18   ;;  %s1010_s17 = sphi %s1081_s17, %s1251_s17   ;;  %s1006_s16 = sphi %s1079_s16, %s1250_s16   ;;  %s1002_s15 = sphi %s1077_s15, %s1249_s15  }
   0x7   : > { %s1102_s20 = sadd.s32 1, %s1014_s18   ;;  %s227_s21 = sadd.s32 1, %s1010_s17 }
   0x8   : > { %s224_s22 = ssub.s32 %s1014_s18, %s1102_s20  ;;  %p237_p0 = scmp.ne.s32.totalorder %s1010_s17, %s1006_s16 }
   0x9   : > { %p225_p1 = scmp.eq.s32.totalorder %s224_s22, 0  ;;  %p238_p2 = scmp.eq.s32.totalorder %s1098_s8, 1 }
   0xa   : > { %p243_p3 = scmp.ne.s32.totalorder %s1006_s16, %s1002_s15  ;;  %p244_p4 = scmp.eq.s32.totalorder %s828_s19, 1 }
   0xb   : > { %s1113_s23 = scalar_select %p225_p1, %s1010_s17, %s227_s21  }
   0xc   : > { %p1115_p5 = por %p238_p2, %p237_p0  ;;  %p1119_p6 = por %p244_p4, %p243_p3 }
   0xd   : > { %p831_p7 = scmp.ge.s32.totalorder %s1014_s18, 1  ;;  %p319_p8 = scmp.lt.s32.totalorder %s1014_s18, 3 }
   0xf   : > { %p320_p9 = pnand %p831_p7, %p319_p8 }
  0x10   : > { %p360_p10 = scmp.lt.s32.totalorder (!%p320_p9), %s1098_s8, 1  ;;  %s844_s27 = sshll.u32 (!%p320_p9), %s1098_s8, 7 }
  0x11   : > { %323 = sbr.rel (%p320_p9) target bundleno = 942 (0x3ae), region = 56  ;;  %s740_s11 = scalar_lea.hbm (!%p320_p9), %s1245_s9, %s844_s27 }
  0x16   : > { %v370_v1 = vld [vmem:[%s1237_s1 + $0x8] sm:$0xff]  ;;  %v1016_v2 = vmov 0.0   ;;  %v369_v3 = vld [vmem:[%s1237_s1] sm:$0xff]  ;;  %vm1017_vm0 = vmmov 0   ;;  %v456_v4 = vld [vmem:[%s1239_s3 + $0x18] sm:$0xff]  ;;  %s1137_s12 = scalar_select %p360_p10, %s1098_s8, 1 }
  0x17   : > { %865 = vmatprep.subr.mxu0 %v1016_v2  ;;  %869 = vmatprep.mubr.msk.f32.mxu0 %vm1017_vm0, %v1016_v2  ;;  %vm378_vm1 = vcmask 130048   ;;  %v455_v6 = vld [vmem:[%s1239_s3 + $0x10] sm:$0xff]  ;;  %v454_v7 = vld [vmem:[%s1239_s3 + $0x8] sm:$0xff]  ;;  %v453_v8 = vld [vmem:[%s1239_s3] sm:$0xff]  ;;  %vm464_vm2 = vcmask 261120   ;;  %vm722_vm3 = vcmask 7168  }
  0x18   : > { %866 = vmatpush3.msra.mxu0 %v370_v1  ;;  %872 = vmatprep.subr.mxu1 %v1016_v2  ;;  %s833_s13 = sshll.u32 %s1137_s12, 3  ;;  %v542_v9 = vld [vmem:[%s1241_s5 + $0x18] sm:$0xff]  ;;  %v835_v10 = vld [vmem:[%s1238_s2] ss:$0 sm:$0xff]  ;;  %v541_v16 = vld [vmem:[%s1241_s5 + $0x10] sm:$0xff]  ;;  %s351_s12 = sand.u32 1, %s1006_s16  }
  0x19   : > { %867 = vmatprep.subr.mxu0 %v1016_v2  ;;  %873 = vmatpush3.msra.mxu1 %v456_v4  ;;  %s363_s21 = scalar_lea.vmem %s1236_s0, %s833_s13  ;;  %v638_v15 = vld [vmem:[%s1243_s7 + $0x18] sm:$0xff]  ;;  %v637_v17 = vld [vmem:[%s1243_s7 + $0x10] sm:$0xff]  ;;  %v540_v18 = vld [vmem:[%s1241_s5 + $0x8] sm:$0xff]  ;;  %s367_s22 = scalar_lea.vmem %s1246_s10, %s833_s13 }
  0x1a   : > { %868 = vmatpush3.msra.mxu0 %v369_v3  ;;  %874 = vmatprep.subr.mxu1 %v1016_v2  ;;  %v368_v5 = vld [vmem:[%s363_s21] sm:$0xff]  ;;  %v636_v19 = vld [vmem:[%s1243_s7 + $0x8] sm:$0xff]  ;;  %s832_s26 = sshll.u32 %s351_s12, 3  ;;  %s725_s14 = scalar_lea.sflag [#allocation4], %s351_s12 }
  0x1b   : > { %880 = vmatprep.mubr.msk.f32.mxu1 %vm1017_vm0, %v1016_v2  ;;  %883 = vmatprep.subr.mxu0 %v1016_v2  ;;  %v539_v20 = vld [vmem:[%s1241_s5] sm:$0xff]  ;;  %s353_s28 = scalar_lea.vmem [#allocation3], %s832_s26  ;;  %s1018_s21 = smov [#allocation3]  }
  0x1c   : > { %870 = vmatmul.mubr.msk.f32.vlgmr.msra.gmra.mxu0 %vm378_vm1, %v368_v5  ;;  %875 = vmatpush3.msra.mxu1 %v455_v6  ;;  %v635_v21 = vld [vmem:[%s1243_s7] sm:$0xff]  ;;  %s742_s29 = sshll.u32 %s353_s28, 4  ;;  %s743_s29 = int_to_ptr.vmem [resolvable:$true] %s742_s29 }
  0x1d   : > { %891 = vmatprep.mubr.msk.f32.mxu0 %vm1017_vm0, %v1016_v2  ;;  %876 = vmatprep.subr.mxu1 %v1016_v2  ;;  %v837_v22 = vld [vmem:[%s1240_s4] ss:$0 sm:$0xff]  ;;  %s954_s19 = scalar_lea.vmem %s743_s29, 128 }
  0x1e   : > { %877 = vmatpush3.msra.mxu1 %v454_v7  ;;  %884 = vmatpush3.msra.mxu0 %v542_v9  ;;  %v839_v27 = vld [vmem:[%s1242_s6] ss:$0 sm:$0xff]  ;;  %p955_p11 = scmp.ne.s32.totalorder %s743_s29, %s954_s19 }
  0x1f   : > { %878 = vmatprep.subr.mxu1 %v1016_v2  ;;  %885 = vmatprep.subr.mxu0 %v1016_v2  ;;  %v841_v28 = vld [vmem:[#allocation2] ss:$0 sm:$0xff] }
  0x20   : > { %879 = vmatpush3.msra.mxu1 %v453_v8  ;;  %886 = vmatpush3.msra.mxu0 %v541_v16  ;;  %p956_p12 = pnand %p955_p11, %p1115_p5 }
  0x21   : > { %894 = vmatprep.subr.mxu1 %v1016_v2  ;;  %887 = vmatprep.subr.mxu0 %v1016_v2 }
  0x22   : > { %888 = vmatpush3.msra.mxu0 %v540_v18  ;;  %p957_p13 = pneg %p956_p12 }
  0x23   : > { %889 = vmatprep.subr.mxu0 %v1016_v2 }
  0x24   : > { %890 = vmatpush3.msra.mxu0 %v539_v20 }
  0xdc   : > { %v448_v11 = vpop.f32.mrf.mxu0 }
  0xdd   : > { %v449_v12 = vadd.f32 %v835_v10, %v448_v11 }
  0xde   : > { %v871_v13 = vpop.f32.mrf.mxu0 }
  0xdf   : > { %v452_v14 = vmax.f32 %v449_v12, 0.0 }
  0xe1   : > { %881 = vmatmul.mubr.msk.f32.vlgmr.msra.gmra.mxu1 %vm464_vm2, %v452_v14 }
  0xe2   : > { %895 = vmatpush3.msra.mxu1 %v638_v15  ;;  %902 = vmatprep.mubr.msk.f32.mxu1 %vm1017_vm0, %v1016_v2 }
  0xe3   : > { %896 = vmatprep.subr.mxu1 %v1016_v2 }
  0xe4   : > { %897 = vmatpush3.msra.mxu1 %v637_v17 }
  0xe5   : > { %898 = vmatprep.subr.mxu1 %v1016_v2 }
  0xe6   : > { %899 = vmatpush3.msra.mxu1 %v636_v19 }
  0xe7   : > { %900 = vmatprep.subr.mxu1 %v1016_v2 }
  0xe8   : > { %901 = vmatpush3.msra.mxu1 %v635_v21 }
 0x1a1   : > { %v534_v23 = vpop.f32.mrf.mxu1 }
 0x1a2   : > { %v535_v24 = vadd.f32 %v837_v22, %v534_v23 }
 0x1a3   : > { %v882_v25 = vpop.f32.mrf.mxu1 }
 0x1a4   : > { %v538_v26 = vmax.f32 %v535_v24, 0.0 }
 0x1a6   : > { %892 = vmatmul.mubr.msk.f32.vlgmr.msra.gmra.mxu0 %vm464_vm2, %v538_v26  ;;  %903 = vmatmul.mubr.msk.f32.vlgmr.msra.gmra.mxu1 %vm464_vm2, %v538_v26 }
 0x266   : > { %v619_v29 = vpop.f32.mrf.mxu0  ;;  %v712_v30 = vpop.f32.mrf.mxu1 }
 0x267   : > { %v620_v31 = vadd.f32 %v839_v27, %v619_v29  ;;  %v713_v32 = vadd.f32 %v841_v28, %v712_v30 }
 0x268   : > { %v893_v33 = vpop.f32.mrf.mxu0  ;;  %v904_v34 = vpop.f32.mrf.mxu1 }
 0x269   : > { %v716_v35 = vsub.f32 0.0, %v713_v32  ;;  %v623_v36 = vsel %vm378_vm1, %v620_v31, -inf }
 0x26a   : > { %624 = vmax.xlane.f32.xlu0 %v623_v36 }
 0x26b   : > { %v717_v37 = vmul.f32 1.442695, %v716_v35 }
 0x26d   : > { %946 = vpow2.f32 %v717_v37 }
 0x27a   : > { %v947_v38 = vpop.eup %946 }
 0x27b   : > { %v719_v39 = vadd.f32 1.0, %v947_v38 }
 0x27d   : > { %948 = vrcp.f32 %v719_v39 }
 0x28a   : > { %v949_v40 = vpop.eup %948 }
 0x28b   : > { %723 = vst.msk [vmem:[%s367_s22] sm:$0xff] %vm722_vm3, %v949_v40  ;;  %s958_s22 = sshll.u32 %s1018_s21, 4  ;;  %s959_s22 = int_to_ptr.vmem [resolvable:$false] %s958_s22 }
 0x28c   : > { %s960_s8 = scalar_lea.vmem %s959_s22, 256  ;;  %p961_p0 = scmp.lt.s32.totalorder %s743_s29, %s959_s22 }
 0x28d   : > { %p962_p1 = scmp.lt.s32.totalorder %s960_s8, %s954_s19 }
 0x28f   : > { %p963_p2 = por %p962_p1, %p961_p0 }
 0x291   : > { %p964_p3 = pnand %p963_p2, %p957_p13 }
 0x2f3   : > { %v625_v41 = vpop.xlane.xlu0 %624 }
 0x2f4   : > { %v626_v42 = vsub.f32 %v620_v31, %v625_v41 }
 0x2f6   : > { %v627_v43 = vmul.f32 1.442695, %v626_v42 }
 0x2f8   : > { %950 = vpow2.f32 %v627_v43 }
 0x305   : > { %v951_v44 = vpop.eup %950 }
 0x306   : > { %v629_v45 = vsel %vm378_vm1, %v951_v44, 0.0 }
 0x307   : > { %630 = vadd.xlane.f32.xlu0 %v629_v45 }
 0x390   : > { %v631_v46 = vpop.xlane.xlu0 %630 }
 0x391   : > { %952 = vrcp.f32 %v631_v46 }
 0x39e   : > { %v953_v47 = vpop.eup %952 }
 0x39f   : > { %v633_v48 = vmul.f32 %v953_v47, %v951_v44 }
 0x3a1   : > { %634 = vst.msk [vmem:[%s353_s28] sm:$0xff] %vm378_vm1, %v633_v48 }
 0x3a2   : > { %967 = shalt.err (!%p964_p3)
}
 0x3a3   : > { %s968_s26 = scalar_lea.hbm %s740_s11, 128  ;;  %s972_s28 = scalar_lea.hbm %s1245_s9, 256 }
 0x3a4   : > { %p969_p4 = scmp.ne.s32.totalorder %s740_s11, %s968_s26  ;;  %p973_p9 = scmp.lt.s32.totalorder %s740_s11, %s1245_s9 }
 0x3a5   : > { %p974_p10 = scmp.lt.s32.totalorder %s972_s28, %s968_s26 }
 0x3a6   : > { %p970_p7 = pnand %p969_p4, %p1115_p5 }
 0x3a7   : > { %p975_p11 = por %p974_p10, %p973_p9 }
 0x3a8   : > { %p971_p8 = pneg %p970_p7 }
 0x3aa   : > { %p976_p12 = pnand %p975_p11, %p971_p8 }
 0x3ac   : > { %979 = shalt.err (!%p976_p12)
}
 0x3ad   : > { %905 = dma.vmem_to_hbm [thread:$0]  (%p1115_p5), %s743_s29, 128, %s740_s11, %s725_s14  }
 0x3ae PF: > { %p911_p13 = scmp.ge.s32.totalorder %s1014_s18, 2  ;;  %s757_s19 = sand.u32 1, %s1002_s15  }
 0x3af   : > { %s758_s21 = scalar_lea.sflag [#allocation4], %s757_s19 }
 0x3b0   : > { %p908_p0 = pnand %p911_p13, %p1119_p6 }
 0x3b2   : > { %p909_p1 = pneg %p908_p0 }
 0x3b4   : > { %997 = dma.done.wait (%p909_p1), %s758_s21, 128  }
 0x3b5   : > { %999 = vsyncadd (%p909_p1), %s758_s21, 4294967168  ;;  %p23_p2 = scmp.ge.s32.totalorder %s1102_s20, 4   ;;  %s1249_s15 = smov %s1006_s16 }
 0x3b6   : > { %s1250_s16 = smov %s1010_s17  ;;  %s1251_s17 = smov %s1113_s23 }
 0x3b7   : > { %s1252_s18 = smov %s1102_s20  ;;  %25 = sbr.rel (!%p23_p2) target bundleno = 6 (0x6), region = 103 }
 0x3bc   :  { %770 = vsyncpa [#allocation4], 1 }
 0x3bd   :  { %772 = vsyncpa [#allocation4 + $0x1], 1 }

</bundles_post_ra>
